<compile_context>
chip_gen: v6e
topology: v6e:2x2x1
jax: 0.10.0
libtpu: 0.0.40
codegen_flags: <defaults>
</compile_context>

<pallas_src>
import math
import functools

import jax
import jax.numpy as jnp
from jax import lax
from jax.experimental import pallas as pl
from jax.experimental.pallas import tpu as pltpu


# --------------------------------------------------------------------------- #
# Tiled linear projection kernel:  y = x @ W^T + b   (W pre-transposed on host)
# --------------------------------------------------------------------------- #
def _linear_kernel(x_ref, wT_ref, b_ref, o_ref):
    # x_ref: (1, row_tile, d_in) compute dtype; wT_ref: (d_in, d_out); b_ref: (1, d_out) f32
    y = jnp.dot(x_ref[0], wT_ref[...], preferred_element_type=jnp.float32) + b_ref[...]
    o_ref[0] = y.astype(o_ref.dtype)


def _linear(x, wT, b, *, out_dtype, row_tile, vmem_limit):
    bs, seq, d_in = x.shape
    d_out = wT.shape[1]
    assert seq % row_tile == 0
    nrows = seq // row_tile
    return pl.pallas_call(
        _linear_kernel,
        out_shape=jax.ShapeDtypeStruct((bs, seq, d_out), out_dtype),
        grid_spec=pltpu.PrefetchScalarGridSpec(
            num_scalar_prefetch=0,
            grid=(bs, nrows),
            in_specs=[pl.BlockSpec((1, row_tile, d_in), lambda bi, ri: (bi, ri, 0)),
                      pl.BlockSpec((d_in, d_out), lambda bi, ri: (0, 0)),
                      pl.BlockSpec((1, d_out), lambda bi, ri: (0, 0))],
            out_specs=pl.BlockSpec((1, row_tile, d_out), lambda bi, ri: (bi, ri, 0))),
        compiler_params=pltpu.CompilerParams(
            dimension_semantics=("parallel", "parallel"),
            vmem_limit_bytes=vmem_limit),
    )(x, wT, b)


# --------------------------------------------------------------------------- #
# Fused attention kernel: Q projection + per-head softmax(QK^T)V + Wo projection
# --------------------------------------------------------------------------- #
def _mha_kernel(heads, d_k, compute_dtype, exact_softmax,
                q_ref, kp_ref, vp_ref,
                wqT_ref, bq_ref, woT_ref, bo_ref,
                out_ref,
                ho_sc):
    """Grid = (batch, q_tiles).

    q_ref : (1, q_tile, d_model)  raw queries, compute dtype.
    kp/vp : (1, seq, d_model)     pre-projected keys/values, compute dtype.
    wqT already carries the 1/sqrt(d_k) scale (folded on the host).
    """
    # Q projection for this tile (no in-kernel weight transpose, no scale mul).
    qp = jnp.dot(q_ref[0], wqT_ref[...], preferred_element_type=jnp.float32) + bq_ref[...]
    qp = qp.astype(compute_dtype)                       # (q_tile, d_model)

    kp = kp_ref[0]                                      # (seq, d_model)
    vp = vp_ref[0]

    # Contract the shared d_k axis directly: q @ k^T without materializing k^T.
    qk_dims = (((1,), (1,)), ((), ()))

    # Per-head outputs are written into a (q_tile, d_model) scratch so the output
    # projection is ONE full-K (d_model) matmul instead of `heads` K=d_k matmuls.
    for h in range(heads):                              # static unroll over heads
        sl = slice(h * d_k, (h + 1) * d_k)
        qh = qp[:, sl]                                  # (q_tile, d_k)
        kh = kp[:, sl]                                  # (seq,    d_k)
        vh = vp[:, sl]                                  # (seq,    d_k)

        s = lax.dot_general(qh, kh, dimension_numbers=qk_dims,
                            preferred_element_type=jnp.float32)  # (q_tile, seq)

        # Numerically stable softmax, kept in f32 (v5e has no bf16 VPU/EUP).
        m = jnp.max(s, axis=-1, keepdims=True)
        e = jnp.exp(s - m)
        denom = jnp.sum(e, axis=-1, keepdims=True)
        if exact_softmax:
            p = e / denom
        else:
            p = e * pl.reciprocal(denom, approx=True)   # EUP slot, ~free

        ho = jnp.dot(p.astype(compute_dtype), vh,
                     preferred_element_type=jnp.float32)          # (q_tile, d_k)
        ho_sc[:, sl] = ho.astype(compute_dtype)

    out = jnp.dot(ho_sc[...], woT_ref[...],
                  preferred_element_type=jnp.float32) + bo_ref[...]
    out_ref[0] = out.astype(out_ref.dtype)


# --------------------------------------------------------------------------- #
# Host-side wrapper
# --------------------------------------------------------------------------- #
def _pick_tile(n, cap=128):
    """Largest multiple of 8 that divides n, capped at `cap`; falls back to n."""
    if n <= cap:
        return n
    for t in range(cap, 7, -8):
        if n % t == 0:
            return t
    return n  # TODO(synk): pad ragged sequence lengths instead of full-seq tiles.


def _vmem_limit(seq, q_tile, d_model, cd_bytes, out_bytes):
    blocks = (q_tile * d_model * cd_bytes          # q tile
              + 2 * seq * d_model * cd_bytes       # kp, vp blocks
              + q_tile * d_model * out_bytes)      # out tile
    weights = 2 * d_model * d_model * cd_bytes + 2 * d_model * 4
    scratch = q_tile * d_model * cd_bytes
    est = 2 * (blocks + weights) + scratch         # double-buffered pipeline
    return int(min(max(4 * est, 32 * 2 ** 20), 64 * 2 ** 20))


def multi_head_attention(q, k, v, params, *, heads,
                         compute_dtype=jnp.bfloat16, q_tile=None):
    """q, k, v: (bs, seq, d_model) float32.  params: PyTorch-convention weights."""
    bs, seq, d_model = q.shape
    assert d_model % heads == 0
    d_k = d_model // heads
    scale = 1.0 / math.sqrt(d_k)

    exact_softmax = jnp.dtype(compute_dtype) == jnp.dtype(jnp.float32)
    cd_bytes = jnp.dtype(compute_dtype).itemsize
    out_bytes = jnp.dtype(q.dtype).itemsize

    # nn.Linear: y = x @ W.T + b.  Pre-transpose + pre-cast once on the host; the
    # softmax scale 1/sqrt(d_k) is folded into the Q projection weight and bias.
    wqT = (jnp.asarray(params["wq"], jnp.float32).T * scale).astype(compute_dtype)
    wkT = jnp.asarray(params["wk"], jnp.float32).T.astype(compute_dtype)
    wvT = jnp.asarray(params["wv"], jnp.float32).T.astype(compute_dtype)
    woT = jnp.asarray(params["wo"], jnp.float32).T.astype(compute_dtype)
    bq = (jnp.asarray(params["bq"], jnp.float32) * scale).reshape(1, d_model)
    bk = jnp.asarray(params["bk"], jnp.float32).reshape(1, d_model)
    bv = jnp.asarray(params["bv"], jnp.float32).reshape(1, d_model)
    bo = jnp.asarray(params["bo"], jnp.float32).reshape(1, d_model)

    # Cast activations to the compute dtype on the host: halves the DMA bytes and
    # VMEM residency of every activation block and removes in-kernel VPU casts.
    q_c = q.astype(compute_dtype)
    k_c = k.astype(compute_dtype)
    v_c = v.astype(compute_dtype)

    row_tile = _pick_tile(seq)
    if q_tile is None:
        q_tile = _pick_tile(seq)
    assert seq % q_tile == 0
    nq = seq // q_tile

    vmem_limit = _vmem_limit(seq, q_tile, d_model, cd_bytes, out_bytes)

    # Hoisted K / V projections (separate tiled Pallas kernel): the attention
    # kernel never holds raw K/V + projected K/V at once.
    kp = _linear(k_c, wkT, bk, out_dtype=compute_dtype, row_tile=row_tile,
                 vmem_limit=vmem_limit)
    vp = _linear(v_c, wvT, bv, out_dtype=compute_dtype, row_tile=row_tile,
                 vmem_limit=vmem_limit)

    qspec = pl.BlockSpec((1, q_tile, d_model), lambda b, i: (b, i, 0))
    kvspec = pl.BlockSpec((1, seq, d_model), lambda b, i: (b, 0, 0))
    wspec = pl.BlockSpec((d_model, d_model), lambda b, i: (0, 0))
    bspec = pl.BlockSpec((1, d_model), lambda b, i: (0, 0))

    kernel = functools.partial(_mha_kernel, heads, d_k, compute_dtype, exact_softmax)

    return pl.pallas_call(
        kernel,
        out_shape=jax.ShapeDtypeStruct((bs, seq, d_model), q.dtype),
        grid_spec=pltpu.PrefetchScalarGridSpec(
            num_scalar_prefetch=0,
            grid=(bs, nq),
            in_specs=[qspec, kvspec, kvspec,
                      wspec, bspec, wspec, bspec],
            out_specs=qspec,
            scratch_shapes=[pltpu.VMEM((q_tile, d_model), compute_dtype)]),
        # With K/V projections hoisted there is no cross-q-tile state, so both
        # grid axes are "parallel" (megacore sharding even when bs < num cores).
        compiler_params=pltpu.CompilerParams(
            dimension_semantics=("parallel", "parallel"),
            vmem_limit_bytes=vmem_limit),
    )(q_c, kp, vp, wqT, bq, woT, bo)


# --------------------------------------------------------------------------- #
# Pure-JAX reference mirroring the PyTorch forward (eval mode, mask=None)
# --------------------------------------------------------------------------- #
def _reference_mha(q, k, v, params, heads):
    bs, seq, d_model = q.shape
    d_k = d_model // heads

    def lin(x, w, b):
        return x @ w.T + b

    qp = lin(q, params["wq"], params["bq"]).reshape(bs, seq, heads, d_k).transpose(0, 2, 1, 3)
    kp = lin(k, params["wk"], params["bk"]).reshape(bs, seq, heads, d_k).transpose(0, 2, 1, 3)
    vp = lin(v, params["wv"], params["bv"]).reshape(bs, seq, heads, d_k).transpose(0, 2, 1, 3)

    scores = jnp.einsum("bhqd,bhkd->bhqk", qp, kp) / math.sqrt(d_k)
    scores = jax.nn.softmax(scores, axis=-1)
    out = jnp.einsum("bhqk,bhkd->bhqd", scores, vp)
    concat = out.transpose(0, 2, 1, 3).reshape(bs, seq, d_model)
    return lin(concat, params["wo"], params["bo"])


if __name__ == "__main__":
    bs, seq, d_model, heads = 2, 8, 32, 4

    key = jax.random.PRNGKey(0)
    keys = jax.random.split(key, 11)

    # Deterministic parameter init (nn.Linear-style uniform bound).
    bound = 1.0 / math.sqrt(d_model)

    def u(kk, shape):
        return jax.random.uniform(kk, shape, jnp.float32, -bound, bound)

    params = {
        "wq": u(keys[0], (d_model, d_model)), "bq": u(keys[1], (d_model,)),
        "wk": u(keys[2], (d_model, d_model)), "bk": u(keys[3], (d_model,)),
        "wv": u(keys[4], (d_model, d_model)), "bv": u(keys[5], (d_model,)),
        "wo": u(keys[6], (d_model, d_model)), "bo": u(keys[7], (d_model,)),
    }

    q = jax.random.normal(keys[8], (bs, seq, d_model), jnp.float32)
    k = jax.random.normal(keys[9], (bs, seq, d_model), jnp.float32)
    v = jax.random.normal(keys[10], (bs, seq, d_model), jnp.float32)

    ref = _reference_mha(q, k, v, params, heads)

    # Performance path: bf16 matmul operands, f32 accumulation + f32 softmax.
    out_bf16 = jax.block_until_ready(multi_head_attention(q, k, v, params, heads=heads))
    assert out_bf16.shape == (bs, seq, d_model)
    assert jnp.allclose(out_bf16, ref, atol=3e-2, rtol=3e-2), "bf16 path mismatch vs reference"

    # Full-precision path (same kernels, f32 operands, exact softmax divide).
    out_f32 = jax.block_until_ready(
        multi_head_attention(q, k, v, params, heads=heads, compute_dtype=jnp.float32))
    assert jnp.allclose(out_f32, ref, atol=5e-3, rtol=5e-3), "f32 path mismatch vs reference"

    print("KERNEL_OK")
</pallas_src>

<mosaic_0001>
module attributes {stable_mosaic.version = 11 : i64} {
  func.func @_linear_kernel(%arg0: i32, %arg1: i32, %arg2: memref<1x8x32xbf16, #tpu.memory_space<vmem>>, %arg3: memref<32x32xbf16, #tpu.memory_space<vmem>>, %arg4: memref<1x32xf32, #tpu.memory_space<vmem>>, %arg5: memref<1x8x32xbf16, #tpu.memory_space<vmem>>) attributes {dimension_semantics = [#tpu.dimension_semantics<parallel>, #tpu.dimension_semantics<parallel>], iteration_bounds = array<i64: 2, 1>, scalar_prefetch = 0 : i64, scratch_operands = 0 : i64, tpu.core_type = #tpu.core_type<tc>, window_params = [{transform_indices = @transform_0, window_bounds = array<i64: 1, 8, 32>}, {pipeline_mode = #tpu.pipeline_mode<synchronous>, transform_indices = @transform_1, window_bounds = array<i64: 32, 32>}, {pipeline_mode = #tpu.pipeline_mode<synchronous>, transform_indices = @transform_2, window_bounds = array<i64: 1, 32>}, {transform_indices = @transform_3, window_bounds = array<i64: 1, 8, 32>}]} {
    %c0 = arith.constant 0 : index
    %c0_0 = arith.constant 0 : index
    %c0_1 = arith.constant 0 : index
    %0 = vector.load %arg2[%c0, %c0_0, %c0_1] : memref<1x8x32xbf16, #tpu.memory_space<vmem>>, vector<1x8x32xbf16>
    %1 = vector.shape_cast %0 : vector<1x8x32xbf16> to vector<8x32xbf16>
    %c0_2 = arith.constant 0 : index
    %c0_3 = arith.constant 0 : index
    %2 = vector.load %arg3[%c0_2, %c0_3] : memref<32x32xbf16, #tpu.memory_space<vmem>>, vector<32x32xbf16>
    %cst = arith.constant dense<0.000000e+00> : vector<8x32xf32>
    %3 = tpu.matmul %1, %2, %cst {dimension_numbers = #tpu.dot_dimension_numbers<[1], [0], [0], [1], [0, 0, 1, 1], [], []>} : vector<8x32xbf16>, vector<32x32xbf16>, vector<8x32xf32> -> vector<8x32xf32>
    %c0_4 = arith.constant 0 : index
    %c0_5 = arith.constant 0 : index
    %4 = vector.load %arg4[%c0_4, %c0_5] : memref<1x32xf32, #tpu.memory_space<vmem>>, vector<1x32xf32>
    %5 = vector.broadcast %4 : vector<1x32xf32> to vector<8x32xf32>
    %6 = arith.addf %3, %5 : vector<8x32xf32>
    %7 = arith.truncf %6 : vector<8x32xf32> to vector<8x32xbf16>
    %c0_6 = arith.constant 0 : index
    %c0_7 = arith.constant 0 : index
    %c0_8 = arith.constant 0 : index
    %8 = vector.load %arg5[%c0_6, %c0_7, %c0_8] : memref<1x8x32xbf16, #tpu.memory_space<vmem>>, vector<1x8x32xbf16>
    %9 = vector.shape_cast %8 : vector<1x8x32xbf16> to vector<8x32xbf16>
    %10 = vector.shape_cast %7 : vector<8x32xbf16> to vector<1x8x32xbf16>
    tpu.vector_store %arg5[%c0_6, %c0_7, %c0_8], %10 {strides = array<i32>} : memref<1x8x32xbf16, #tpu.memory_space<vmem>>, vector<1x8x32xbf16>,
    return
  }
  func.func @transform_0(%arg0: i32, %arg1: i32) -> (i32, i32, i32) {
    %c0_i32 = arith.constant 0 : i32
    %c0_i32_0 = arith.constant 0 : i32
    return %arg0, %arg1, %c0_i32 : i32, i32, i32
  }
  func.func @transform_1(%arg0: i32, %arg1: i32) -> (i32, i32) {
    %c0_i32 = arith.constant 0 : i32
    %c0_i32_0 = arith.constant 0 : i32
    %c0_i32_1 = arith.constant 0 : i32
    return %c0_i32, %c0_i32_0 : i32, i32
  }
  func.func @transform_2(%arg0: i32, %arg1: i32) -> (i32, i32) {
    %c0_i32 = arith.constant 0 : i32
    %c0_i32_0 = arith.constant 0 : i32
    %c0_i32_1 = arith.constant 0 : i32
    return %c0_i32, %c0_i32_0 : i32, i32
  }
  func.func @transform_3(%arg0: i32, %arg1: i32) -> (i32, i32, i32) {
    %c0_i32 = arith.constant 0 : i32
    %c0_i32_0 = arith.constant 0 : i32
    return %arg0, %arg1, %c0_i32 : i32, i32, i32
  }
}

</mosaic_0001>

<bundles_post_ra>
// kernel: tpu_custom_call.1
= control target key start
LH: loop header
LB: loop body
LE: loop exit
PB: predicated region body
PF: predicated region fallthrough
CT: control target
= control target key end

     0   :  { %8 = vsyncpa [#allocation3], 0  ;;  %s853_s0 = inlined_call_operand.hbm [shape: bf16[2,8,32], index: 0, kind: input, shape index: {}]   ;;  %s854_s1 = inlined_call_operand.hbm [shape: bf16[32,32], index: 1, kind: input, shape index: {}]   ;;  %s855_s2 = inlined_call_operand.vmem [shape: f32[1,32], index: 2, kind: input, shape index: {}]   ;;  %s856_s3 = inlined_call_operand.hbm [shape: bf16[2,8,32], index: 3, kind: output, shape index: {}]  }
   0x1   :  { %10 = vsyncpa [#allocation3 + $0x1], 0 }
   0x2   :  { %11 = vsyncpa [#allocation6], 0 }
   0x3   :  { %12 = vsyncpa [#allocation4], 0 }
   0x4   :  { %14 = vsyncpa [#allocation4 + $0x1], 0  ;;  %s671_s12 = smov 0   ;;  %s673_s13 = smov 0  }
   0x5   :  { %s675_s14 = smov 0   ;;  %s677_s15 = smov 0  }
   0x6   :  { %s679_s16 = smov 0   ;;  %s681_s17 = smov 0  }
   0x7 LB: > { %s395_s18 = sadd.s32 4294967295, %s642_s17   ;;  %s396_s19 = sadd.s32 4294967294, %s642_s17   ;;  %s642_s17 = sphi %s681_s17, %s20_s17   ;;  %s638_s16 = sphi %s679_s16, %s874_s16   ;;  %s634_s15 = sphi %s677_s15, %s873_s15   ;;  %s630_s14 = sphi %s675_s14, %s872_s14   ;;  %s626_s13 = sphi %s673_s13, %s871_s13   ;;  %s622_s12 = sphi %s671_s12, %s870_s12  }
   0x8   : > { %p54_p0 = scmp.ne.s32.totalorder %s626_s13, %s622_s12  ;;  %p705_p1 = scmp.eq.s32.totalorder %s395_s18, 0 }
   0x9   : > { %p709_p2 = scmp.eq.s32.totalorder %s395_s18, 1  ;;  %p128_p3 = scmp.eq.s32.totalorder %s396_s19, 1 }
   0xa   : > { %p715_p4 = por %p705_p1, %p54_p0  ;;  %p397_p5 = scmp.ge.s32.totalorder %s642_s17, 1 }
   0xb   : > { %p720_p6 = por %p128_p3, %p54_p0  ;;  %p135_p7 = scmp.lt.s32.totalorder %s642_s17, 3 }
   0xc   : > { %s860_s22 = scalar_select %p715_p4, 1, 0 }
   0xd   : > { %s861_s23 = scalar_select %p720_p6, 1, 0 }
   0xe   : > { %p725_p8 = pnand %p397_p5, %p135_p7  ;;  %s644_s25 = smov [#allocation5]  }
   0xf   : > { %s147_s26 = sshll.u32 %s644_s25, 4  ;;  %s32_s28 = sadd.s32 1, %s638_s16  ;;  %s148_s26 = int_to_ptr.vmem [resolvable:$true] %s147_s26 }
  0x10   : > { %p433_p9 = pneg %p725_p8  ;;  %s515_s29 = scalar_lea.vmem %s148_s26, 256 }
  0x11   : > { %p516_p13 = scmp.ne.s32.totalorder %s148_s26, %s515_s29  ;;  %p523_p5 = scmp.lt.s32.totalorder %s148_s26, %s148_s26 }
  0x12   : > { %p734_p11 = pnand %p433_p9, %p705_p1  ;;  %p524_p7 = scmp.lt.s32.totalorder %s515_s29, %s515_s29 }
  0x14   : > { %p506_p12 = pneg %p734_p11  ;;  %p525_p6 = por %p524_p7, %p523_p5 }
  0x16   : > { %p518_p0 = pnand %p516_p13, %p506_p12 }
  0x18   : > { %p519_p3 = pneg %p518_p0 }
  0x1a   : > { %p526_p4 = pnand %p525_p6, %p519_p3 }
  0x1c   : > { %529 = shalt.err (!%p526_p4)
}
  0x1d   : > { %s645_s30 = smov 64   ;;  %s646_s4 = smov 4  }
  0x1e   : > { %436 = dma.hbm_to_vmem [thread:$0]  (!%p734_p11), %s854_s1, 256, %s148_s26, [#allocation6], %s645_s30, %s645_s30, %s646_s4  }
  0x1f   : > { %p34_p6 = scmp.ge.s32.totalorder %s32_s28, 2  ;;  %s41_s7 = sadd.s32 1, %s630_s14 }
  0x20   : > { %p48_p4 = scmp.ne.s32.totalorder %s630_s14, %s626_s13  ;;  %p49_p9 = scmp.eq.s32.totalorder %s642_s17, 0 }
  0x21   : > { %s876_s28 = smov (%p34_p6, %s32_s28), 0  ;;  %p446_p0 = scmp.lt.s32.totalorder %s642_s17, 2 }
  0x22   : > { %p752_p12 = por %p49_p9, %p48_p4  ;;  %p758_p13 = por %p709_p2, %p48_p4 }
  0x23   : > { %s36_s10 = ssub.s32 %s638_s16, %s876_s28  ;;  %s164_s11 = sand.u32 1, %s630_s14  }
  0x24   : > { %p39_p11 = scmp.eq.s32.totalorder %s36_s10, 0  ;;  %s400_s18 = sshll.u32 %s164_s11, 2 }
  0x25   : > { %s401_s25 = sshll.u32 %s638_s16, 6  ;;  %s168_s30 = scalar_lea.vmem [#allocation2], %s400_s18 }
  0x26   : > { %s767_s19 = scalar_select %p39_p11, %s630_s14, %s41_s7  }
  0x27   : > { %s174_s29 = scalar_lea.hbm %s853_s0, %s401_s25  ;;  %s176_s4 = sshll.u32 %s168_s30, 4  ;;  %s177_s4 = int_to_ptr.vmem [resolvable:$true] %s176_s4 }
  0x28   : > { %p775_p2 = pnand %p446_p0, %p752_p12  ;;  %s165_s5 = scalar_lea.sflag [#allocation3], %s164_s11 }
  0x29   : > { %s543_s6 = scalar_lea.vmem %s177_s4, 64  ;;  %s647_s7 = smov [#allocation2]  }
  0x2a   : > { %p532_p3 = pneg %p775_p2  ;;  %p544_p5 = scmp.ne.s32.totalorder %s177_s4, %s543_s6 }
  0x2b   : > { %s548_s10 = sshll.u32 %s647_s7, 4  ;;  %s549_s10 = int_to_ptr.vmem [resolvable:$false] %s548_s10 }
  0x2c   : > { %p546_p7 = pnand %p544_p5, %p532_p3  ;;  %s550_s25 = scalar_lea.vmem %s549_s10, 128 }
  0x2d   : > { %p551_p4 = scmp.lt.s32.totalorder %s177_s4, %s549_s10  ;;  %p552_p9 = scmp.lt.s32.totalorder %s550_s25, %s543_s6 }
  0x2e   : > { %p547_p6 = pneg %p546_p7 }
  0x2f   : > { %p553_p11 = por %p552_p9, %p551_p4 }
  0x31   : > { %p554_p10 = pnand %p553_p11, %p547_p6 }
  0x33   : > { %557 = shalt.err (!%p554_p10)
}
  0x34   : > { %440 = dma.hbm_to_vmem [thread:$0]  (!%p775_p2), %s174_s29, 64, %s177_s4, %s165_s5  }
  0x35   : > { %185 = sbr.rel (%p725_p8) target bundleno = 281 (0x119), region = 32  ;;  %s786_s8 = sand.u32 (!%p725_p8), 1, %s626_s13  }
  0x36   : > { %s403_s11 = sshll.u32 (!%p725_p8), %s786_s8, 2  ;;  %s188_s18 = scalar_lea.sflag (!%p725_p8), [#allocation3], %s786_s8 }
  0x37   : > { %s191_s26 = scalar_lea.vmem (!%p725_p8), [#allocation2], %s403_s11  ;;  %p867_p12 = scmp.ne.s32.totalorder (!%p725_p8), %s860_s22, 0 }
  0x3a   : > { %609 = dma.done.wait (%p867_p12), %s188_s18, 64  }
  0x3b   : > { %611 = vsyncadd (%p867_p12), %s188_s18, 4294967232 }
  0x3c   : > { %613 = dma.done.wait (%p705_p1), [#allocation6], 256  }
  0x3d   : > { %615 = vsyncadd (%p705_p1), [#allocation6], 4294967040  ;;  %v648_v0 = vmov 0.0   ;;  %vm649_vm0 = vmmov 0   ;;  %v502_v1 = vld [vmem:[#allocation5 + $0x8] sm:$0xff]   ;;  %v503_v2 = vld [vmem:[#allocation5] sm:$0xff]  }
  0x3e   : > { %417 = vmatprep.subr.bf16.mxu0 %v648_v0  ;;  %421 = vmatprep.mubr.msk.bf16.mxu0 %vm649_vm0, %v648_v0  ;;  %v219_v3 = vld [vmem:[%s191_s26] sm:$0xf]  ;;  %vm243_vm1 = vcmask 261120   ;;  %s411_s20 = sshll.u32 %s634_s15, 6  ;;  %s217_s27 = scalar_lea.vmem [#allocation7], %s403_s11  ;;  %vm288_vm2 = vcmask 257024  }
  0x3f   : > { %418 = vmatpush3.bf16.msra.mxu0 %v502_v1  ;;  %v406_v4 = vld [vmem:[%s855_s2] ss:$0 sm:$0xff]  ;;  %s305_s29 = sshll.u32 %s217_s27, 4  ;;  %s805_s21 = scalar_lea.hbm %s856_s3, %s411_s20  ;;  %s807_s29 = int_to_ptr.vmem [resolvable:$true] %s305_s29 }
  0x40   : > { %419 = vmatprep.subr.bf16.mxu0 %v648_v0  ;;  %s291_s15 = scalar_lea.sflag [#allocation4], %s786_s8  ;;  %s558_s5 = scalar_lea.vmem %s807_s29, 64 }
  0x41   : > { %p559_p1 = scmp.ne.s32.totalorder %s807_s29, %s558_s5  ;;  %s650_s6 = smov [#allocation7]  }
  0x42   : > { %s562_s7 = sshll.u32 %s650_s6, 4  ;;  %s563_s7 = int_to_ptr.vmem [resolvable:$false] %s562_s7 }
  0x43   : > { %420 = vmatpush3.bf16.msra.mxu0 %v503_v2  ;;  %p560_p8 = pnand %p559_p1, %p758_p13  ;;  %s564_s10 = scalar_lea.vmem %s563_s7, 128 }
  0x44   : > { %p565_p0 = scmp.lt.s32.totalorder %s807_s29, %s563_s7  ;;  %p566_p2 = scmp.lt.s32.totalorder %s564_s10, %s558_s5 }
  0x45   : > { %p561_p10 = pneg %p560_p8 }
  0x46   : > { %422 = vmatmul.mubr.msk.bf16.vlgmr.msra.gmra.mxu0 %vm243_vm1, %v219_v3  ;;  %p567_p3 = por %p566_p2, %p565_p0 }
  0x48   : > { %p568_p5 = pnand %p567_p3, %p561_p10 }
 0x106   : > { %v281_v5 = vpop.f32.mrf.mxu0 }
 0x107   : > { %v282_v6 = vadd.f32 %v406_v4, %v281_v5 }
 0x108   : > { %v423_v7 = vpop.f32.mrf.mxu0 }
 0x109   : > { %v287_v8 = vpack.c.bf16 %v282_v6, %v282_v6 }
 0x10a   : > { %v284_v9 = vpop.f32.mrf.mxu0 }
 0x10b   : > { %289 = vst.msk [vmem:[%s217_s27] sm:$0xf] %vm288_vm2, %v287_v8 }
 0x10c   : > { %v424_v10 = vpop.f32.mrf.mxu0 }
 0x10d   : > { %571 = shalt.err (!%p568_p5)
}
 0x10e   : > { %s572_s25 = scalar_lea.hbm %s805_s21, 64  ;;  %s576_s18 = scalar_lea.hbm %s856_s3, 128 }
 0x10f   : > { %p573_p7 = scmp.ne.s32.totalorder %s805_s21, %s572_s25  ;;  %p577_p9 = scmp.lt.s32.totalorder %s805_s21, %s856_s3 }
 0x110   : > { %p578_p11 = scmp.lt.s32.totalorder %s576_s18, %s572_s25 }
 0x111   : > { %p574_p6 = pnand %p573_p7, %p758_p13 }
 0x112   : > { %p579_p12 = por %p578_p11, %p577_p9 }
 0x113   : > { %p575_p4 = pneg %p574_p6 }
 0x115   : > { %p580_p1 = pnand %p579_p12, %p575_p4 }
 0x117   : > { %583 = shalt.err (!%p580_p1)
}
 0x118   : > { %431 = dma.vmem_to_hbm [thread:$0]  (%p758_p13), %s807_s29, 64, %s805_s21, %s291_s15  }
 0x119 PF: > { %s317_s24 = sand.u32 1, %s622_s12   ;;  %p868_p8 = scmp.ne.s32.totalorder %s861_s23, 0 }
 0x11a   : > { %p869_p10 = scmp.ge.s32.totalorder %s642_s17, 2  ;;  %s318_s20 = scalar_lea.sflag [#allocation4], %s317_s24 }
 0x11c   : > { %p442_p0 = pnand %p869_p10, %p868_p8 }
 0x11e   : > { %p443_p2 = pneg %p442_p0 }
 0x120   : > { %617 = dma.done.wait (%p443_p2), %s318_s20, 64  }
 0x121   : > { %619 = vsyncadd (%p443_p2), %s318_s20, 4294967232  ;;  %s20_s17 = sadd.s32 1, %s642_s17   ;;  %s870_s12 = smov %s626_s13 }
 0x122   : > { %p17_p3 = scmp.ge.s32.totalorder %s20_s17, 4   ;;  %s871_s13 = smov %s630_s14 }
 0x123   : > { %s872_s14 = smov %s767_s19  ;;  %s873_s15 = smov %s638_s16 }
 0x124   : > { %s874_s16 = smov %s876_s28  ;;  %19 = sbr.rel (!%p17_p3) target bundleno = 7 (0x7), region = 81 }
 0x129   :  { %323 = vsyncpa [#allocation3], 1 }
 0x12a   :  { %325 = vsyncpa [#allocation3 + $0x1], 1 }
 0x12b   :  { %326 = vsyncpa [#allocation6], 1 }
 0x12c   :  { %327 = vsyncpa [#allocation4], 1 }
 0x12d   :  { %329 = vsyncpa [#allocation4 + $0x1], 1 }

</bundles_post_ra>
